<compile_context>
chip_gen: v7x
topology: tpu7x:2x2x1
jax: 0.10.0
libtpu: 0.0.40
codegen_flags: <defaults>
</compile_context>

<pallas_src>
import math
import functools

import jax
import jax.numpy as jnp
from jax import lax
from jax.experimental import pallas as pl
from jax.experimental.pallas import tpu as pltpu


def build_pe_table(max_len: int, d_model: int) -> jnp.ndarray:
    """Replicates the PyTorch buffer construction exactly.

    Returns pe of shape (max_len, 1, d_model), float32.
    """
    position = jnp.arange(0, max_len, dtype=jnp.float32)[:, None]           # (L, 1)
    div_term = jnp.exp(
        jnp.arange(0, d_model, 2, dtype=jnp.float32)
        * (-math.log(10000.0) / d_model)
    )                                                                        # (D/2,)
    angles = position * div_term                                             # (L, D/2)
    pe = jnp.zeros((max_len, d_model), dtype=jnp.float32)
    pe = pe.at[:, 0::2].set(jnp.sin(angles))
    pe = pe.at[:, 1::2].set(jnp.cos(angles))
    # unsqueeze(0).transpose(0, 1) -> (max_len, 1, d_model)
    return pe[:, None, :]


def _pe_kernel(seed_ref, x_ref, pe_ref, o_ref, *, training: bool, p: float,
               block_s: int, block_b: int):
    # x_ref / o_ref: (tS, tB, D)   pe_ref: (tS, D)
    y = x_ref[...].astype(jnp.float32) + pe_ref[...][:, None, :]

    if training and p > 0.0:
        shape = y.shape                               # (tS, tB, D)
        s0 = pl.program_id(0) * block_s
        b0 = pl.program_id(1) * block_b

        # ---- per-row hash of (seed, s, b): (tS, tB, 1) width ------------
        row_shape = (shape[0], shape[1], 1)
        s_ids = (lax.broadcasted_iota(jnp.int32, row_shape, 0) + s0).astype(jnp.uint32)
        b_ids = (lax.broadcasted_iota(jnp.int32, row_shape, 1) + b0).astype(jnp.uint32)
        seed_u = seed_ref[0].astype(jnp.uint32)

        r = (seed_u ^ s_ids) * jnp.uint32(0x9E3779B1)
        r = (r ^ b_ids) * jnp.uint32(0x85EBCA6B)
        r = r ^ (r >> 16)
        r = r * jnp.uint32(0xC2B2AE35)
        r = r ^ (r >> 13)

        # ---- ~2 full-width rounds mixing the lane index d ---------------
        d_ids = lax.broadcasted_iota(jnp.int32, shape, 2).astype(jnp.uint32)
        h = (r ^ d_ids) * jnp.uint32(0x7FEB352D)      # lowbias32-style finalizer
        h = h ^ (h >> 15)
        h = h * jnp.uint32(0x846CA68B)
        h = h ^ (h >> 16)

        # Integer-threshold compare: keep with probability (1 - p).
        threshold = jnp.uint32(min(int(round(p * 4294967296.0)), 4294967295))
        keep = h >= threshold
        y = jnp.where(keep, y * jnp.float32(1.0 / (1.0 - p)), jnp.float32(0.0))

    o_ref[...] = y.astype(o_ref.dtype)


def _choose_tiles(S: int, B: int, D: int, itemsize: int,
                  budget: int = 4 * 1024 * 1024):
    """Pick (tS, tB) for a (tS, tB, D) block of ~`budget` bytes.

    Constraints: D (lanes) is always the full dim; tB (sublanes) must be a
    multiple of 8 or the full B; tS must be a multiple of 8 or the full S
    (the pe block is (tS, D), so tS is its sublane dim).
    """
    lane_bytes = max(1, D * itemsize)

    if B <= 8 or B * lane_bytes * 8 <= budget:
        tB = B
    else:
        max_b = budget // (8 * lane_bytes)            # leave room for tS >= 8
        tB = max(8, (max_b // 8) * 8)
        tB = min(tB, max(8, (B // 8) * 8))

    row_bytes = tB * lane_bytes
    max_s = max(1, budget // row_bytes)
    if max_s >= S:
        tS = S
    elif max_s >= 8:
        tS = (max_s // 8) * 8
    else:
        tS = min(8, S)
    return tS, tB


def positional_encoding_forward(x, pe_table, *, p: float = 0.2,
                                training: bool = False, seed: int = 0,
                                block_s=None, block_b=None):
    """Pallas forward for PositionalEncoding.

    x:        (S, B, D), any float dtype (math is done in f32 in-kernel)
    pe_table: (max_len, 1, D) float32 (the registered buffer)
    """
    S, B, D = x.shape
    assert pe_table.shape[0] >= S and pe_table.shape[2] == D

    pe2d = pe_table[:S, 0, :].astype(jnp.float32)     # (S, D), tiny

    itemsize = jnp.dtype(x.dtype).itemsize
    tS, tB = _choose_tiles(S, B, D, itemsize)

    # Optional user overrides (coerced to legal block shapes).
    if block_s is not None:
        bs = int(block_s)
        if bs >= S or S < 8:
            tS = S
        else:
            tS = max(8, (bs // 8) * 8)
    if block_b is not None:
        bb = int(block_b)
        if bb >= B or B < 8:
            tB = B
        else:
            tB = max(8, (bb // 8) * 8)

    grid = (pl.cdiv(S, tS), pl.cdiv(B, tB))
    seed_arr = jnp.asarray([seed], dtype=jnp.int32)

    kernel = functools.partial(_pe_kernel, training=bool(training),
                               p=float(p), block_s=tS, block_b=tB)

    out = pl.pallas_call(
        kernel,
        out_shape=jax.ShapeDtypeStruct((S, B, D), x.dtype),
        grid_spec=pl.GridSpec(
            grid=grid,
            in_specs=[
                pl.BlockSpec(memory_space=pltpu.SMEM),               # seed scalar
                pl.BlockSpec((tS, tB, D), lambda s, b: (s, b, 0)),   # x tile
                pl.BlockSpec((tS, D),     lambda s, b: (s, 0)),      # pe tile (S only)
            ],
            out_specs=pl.BlockSpec((tS, tB, D), lambda s, b: (s, b, 0)),
        ),
        compiler_params=pltpu.CompilerParams(
            dimension_semantics=("parallel", "parallel"),
            vmem_limit_bytes=48 << 20,
        ),
    )(seed_arr, x, pe2d)

    return out


if __name__ == "__main__":
    P = 0.2  # global `dropout = 0.2` in the reference script

    # --- Test 1: small single-tile shape, eval mode ----------------------
    S, B, D = 8, 2, 32
    MAX_LEN = 64
    key = jax.random.PRNGKey(0)
    x = jax.random.normal(key, (S, B, D), dtype=jnp.float32)
    pe_table = build_pe_table(MAX_LEN, D)

    out_eval = jax.block_until_ready(
        positional_encoding_forward(x, pe_table, p=P, training=False))
    ref = x + pe_table[:S]
    assert jnp.allclose(out_eval, ref, atol=1e-5), "eval-mode mismatch"

    # --- Test 2: multi-tile grid along S, eval + training ----------------
    S2, B2, D2 = 24, 4, 128
    x2 = jax.random.normal(jax.random.PRNGKey(1), (S2, B2, D2), dtype=jnp.float32)
    pe2 = build_pe_table(64, D2)

    out2 = jax.block_until_ready(
        positional_encoding_forward(x2, pe2, p=P, training=False, block_s=8))
    ref2 = x2 + pe2[:S2]
    assert jnp.allclose(out2, ref2, atol=1e-5), "tiled eval mismatch"

    out2_tr = jax.block_until_ready(
        positional_encoding_forward(x2, pe2, p=P, training=True, seed=1234,
                                    block_s=8))
    keep_mask = out2_tr != 0.0
    # Surviving elements equal ref / (1-p); dropped elements are exactly 0.
    assert jnp.allclose(jnp.where(keep_mask, out2_tr, 0.0),
                        jnp.where(keep_mask, ref2 / (1.0 - P), 0.0),
                        atol=1e-5), "training-mode value mismatch"
    drop_frac = float(1.0 - jnp.mean(keep_mask.astype(jnp.float32)))
    assert 0.08 < drop_frac < 0.35, f"dropout rate off: {drop_frac}"

    # --- Test 3: bf16 I/O (f32 math in-kernel) ---------------------------
    xb = x.astype(jnp.bfloat16)
    outb = jax.block_until_ready(
        positional_encoding_forward(xb, pe_table, p=P, training=False))
    assert outb.dtype == jnp.bfloat16
    assert jnp.allclose(outb.astype(jnp.float32), ref, atol=3e-2, rtol=3e-2), \
        "bf16 eval mismatch"

    print("KERNEL_OK")
</pallas_src>

<mosaic_0001>
module attributes {stable_mosaic.version = 11 : i64} {
  func.func @_pe_kernel(%arg0: i32, %arg1: i32, %arg2: memref<1xi32, #tpu.memory_space<smem>>, %arg3: memref<8x2x32xf32, #tpu.memory_space<vmem>>, %arg4: memref<8x32xf32, #tpu.memory_space<vmem>>, %arg5: memref<8x2x32xf32, #tpu.memory_space<vmem>>) attributes {dimension_semantics = [#tpu.dimension_semantics<parallel>, #tpu.dimension_semantics<parallel>], iteration_bounds = array<i64: 1, 1>, scalar_prefetch = 0 : i64, scratch_operands = 0 : i64, tpu.core_type = #tpu.core_type<tc>, window_params = [{transform_indices = @transform_0, window_bounds = array<i64: 1>}, {transform_indices = @transform_1, window_bounds = array<i64: 8, 2, 32>}, {transform_indices = @transform_2, window_bounds = array<i64: 8, 32>}, {transform_indices = @transform_3, window_bounds = array<i64: 8, 2, 32>}]} {
    %c0 = arith.constant 0 : index
    %c0_0 = arith.constant 0 : index
    %c0_1 = arith.constant 0 : index
    %0 = vector.load %arg3[%c0, %c0_0, %c0_1] : memref<8x2x32xf32, #tpu.memory_space<vmem>>, vector<8x2x32xf32>
    %c0_2 = arith.constant 0 : index
    %c0_3 = arith.constant 0 : index
    %1 = vector.load %arg4[%c0_2, %c0_3] : memref<8x32xf32, #tpu.memory_space<vmem>>, vector<8x32xf32>
    %2 = vector.shape_cast %1 : vector<8x32xf32> to vector<8x1x32xf32>
    %3 = vector.broadcast %2 : vector<8x1x32xf32> to vector<8x2x32xf32>
    %4 = arith.addf %0, %3 : vector<8x2x32xf32>
    %c0_4 = arith.constant 0 : index
    %c0_5 = arith.constant 0 : index
    %c0_6 = arith.constant 0 : index
    %5 = vector.load %arg5[%c0_4, %c0_5, %c0_6] : memref<8x2x32xf32, #tpu.memory_space<vmem>>, vector<8x2x32xf32>
    tpu.vector_store %arg5[%c0_4, %c0_5, %c0_6], %4 {strides = array<i32>} : memref<8x2x32xf32, #tpu.memory_space<vmem>>, vector<8x2x32xf32>,
    return
  }
  func.func @transform_0(%arg0: i32, %arg1: i32) -> i32 {
    %c0_i32 = arith.constant 0 : i32
    %c0_i32_0 = arith.constant 0 : i32
    return %c0_i32 : i32
  }
  func.func @transform_1(%arg0: i32, %arg1: i32) -> (i32, i32, i32) {
    %c0_i32 = arith.constant 0 : i32
    %c0_i32_0 = arith.constant 0 : i32
    return %arg0, %arg1, %c0_i32 : i32, i32, i32
  }
  func.func @transform_2(%arg0: i32, %arg1: i32) -> (i32, i32) {
    %c0_i32 = arith.constant 0 : i32
    %c0_i32_0 = arith.constant 0 : i32
    return %arg0, %c0_i32 : i32, i32
  }
  func.func @transform_3(%arg0: i32, %arg1: i32) -> (i32, i32, i32) {
    %c0_i32 = arith.constant 0 : i32
    %c0_i32_0 = arith.constant 0 : i32
    return %arg0, %arg1, %c0_i32 : i32, i32, i32
  }
}

</mosaic_0001>

<bundles_post_ra>
// kernel: tpu_custom_call.1
= control target key start
LH: loop header
LB: loop body
LE: loop exit
PB: predicated region body
PF: predicated region fallthrough
CT: control target
= control target key end

     0   :  { %9 = vsyncpa [#allocation4], 0  ;;  %s330_s0 = inlined_call_operand.<no memory space> [shape: s32[1], index: 0, kind: input, shape index: {}]   ;;  %s331_s1 = inlined_call_operand.hbm [shape: f32[8,2,32], index: 1, kind: input, shape index: {}]   ;;  %s332_s2 = inlined_call_operand.hbm [shape: f32[8,32], index: 2, kind: input, shape index: {}]   ;;  %s333_s3 = inlined_call_operand.hbm [shape: f32[8,2,32], index: 3, kind: output, shape index: {}]  }
   0x1   :  { %10 = vsyncpa [#allocation7], 0 }
   0x2   :  { %11 = vsyncpa [#allocation5], 0  ;;  %s254_s12 = smov [#allocation3]   ;;  %s182_s16 = scalar_lea.hbm %s331_s1, 256 }
   0x3   :  { %s19_s13 = sshll.u32 %s254_s12, 4  ;;  %p183_p0 = scmp.ne.s32.totalorder %s331_s1, %s182_s16  ;;  %s20_s13 = int_to_ptr.vmem [resolvable:$true] %s19_s13 }
   0x4   :  { %p186_p1 = scmp.lt.u32.totalorder %s182_s16, %s331_s1 }
   0x6   :  { %p188_p2 = pnand %p186_p1, %p183_p0 }
   0x8   :  { %191 = shalt.err (!%p188_p2)
}
   0x9   :  { %s192_s20 = scalar_lea.vmem %s20_s13, 256  ;;  %p197_p4 = scmp.lt.s32.totalorder %s20_s13, %s20_s13 }
   0xa   :  { %p193_p3 = scmp.ne.s32.totalorder %s20_s13, %s192_s20  ;;  %p198_p5 = scmp.lt.s32.totalorder %s192_s20, %s192_s20 }
   0xc   :  { %p199_p6 = por %p198_p5, %p197_p4 }
   0xe   :  { %p200_p7 = pnand %p199_p6, %p193_p3 }
  0x10   :  { %203 = shalt.err (!%p200_p7)
}
  0x11   :  { %s255_s21 = smov 32   ;;  %s256_s22 = smov 2  }
  0x12   :  { %25 = dma.hbm_to_vmem [thread:$0]  %s331_s1, 256, %s20_s13, [#allocation4], %s255_s21, %s255_s21, %s256_s22  }
  0x13   :  { %s257_s25 = smov [#allocation6]   ;;  %s204_s29 = scalar_lea.hbm %s332_s2, 128 }
  0x14   :  { %s32_s26 = sshll.u32 %s257_s25, 4  ;;  %p205_p8 = scmp.ne.s32.totalorder %s332_s2, %s204_s29  ;;  %s33_s26 = int_to_ptr.vmem [resolvable:$true] %s32_s26 }
  0x15   :  { %p208_p9 = scmp.lt.u32.totalorder %s204_s29, %s332_s2 }
  0x17   :  { %p210_p10 = pnand %p208_p9, %p205_p8 }
  0x19   :  { %213 = shalt.err (!%p210_p10)
}
  0x1a   :  { %s214_s7 = scalar_lea.vmem %s33_s26, 128  ;;  %p219_p12 = scmp.lt.s32.totalorder %s33_s26, %s33_s26 }
  0x1b   :  { %p215_p11 = scmp.ne.s32.totalorder %s33_s26, %s214_s7  ;;  %p220_p13 = scmp.lt.s32.totalorder %s214_s7, %s214_s7 }
  0x1d   :  { %p221_p0 = por %p220_p13, %p219_p12 }
  0x1f   :  { %p222_p1 = pnand %p221_p0, %p215_p11 }
  0x21   :  { %225 = shalt.err (!%p222_p1)
}
  0x22   :  { %35 = dma.hbm_to_vmem [thread:$0]  %s332_s2, 128, %s33_s26, [#allocation7]  }
  0x23   :  { %248 = dma.done.wait [#allocation4], 256  }
  0x24   :  { %249 = vsyncadd [#allocation4], 4294967040 }
  0x25   :  { %250 = dma.done.wait [#allocation7], 128  }
  0x26   :  { %251 = vsyncadd [#allocation7], 4294967168  ;;  %v56_v0 = vlaneseq  ;;  %v258_v1 = vmov 1966171168   ;;  %v50_v6 = vld [vmem:[#allocation6] sm:$0xff]  ;;  %vm149_vm0 = vcmask 254976  }
  0x27   :  { %v54_v2 = vunpack.c.l.s4 %v258_v1  ;;  %v52_v9 = vcombine.high %v50_v6, %v50_v6  ;;  %v42_v13 = vld [vmem:[#allocation3] sm:$0x3]  ;;  %v43_v18 = vld [vmem:[#allocation3 + $0x2] sm:$0x3]  ;;  %v44_v19 = vld [vmem:[#allocation3 + $0x4] sm:$0x3] }
  0x28   :  { %v57_v3 = vshrl.u32 %v56_v0, 7  ;;  %v46_v25 = vld [vmem:[#allocation3 + $0x8] sm:$0x3]  ;;  %v45_v26 = vld [vmem:[#allocation3 + $0x6] sm:$0x3]  ;;  %s259_s2 = smov [#allocation8]  }
  0x29   :  { %v55_v4 = vunpack.c.0.s8 %v54_v2  ;;  %v47_v33 = vld [vmem:[#allocation3 + $0xa] sm:$0x3]  ;;  %v48_v34 = vld [vmem:[#allocation3 + $0xc] sm:$0x3]  ;;  %v49_v40 = vld [vmem:[#allocation3 + $0xe] sm:$0x3] }
  0x2a   :  { %v103_v8 = vsub.s32 0, %v57_v3  ;;  %s163_s9 = sshll.u32 %s259_s2, 4  ;;  %s164_s9 = int_to_ptr.vmem [resolvable:$true] %s163_s9 }
  0x2b   :  { %v58_v5 = vsub.s32 %v55_v4, %v57_v3  ;;  %s226_s10 = scalar_lea.vmem %s164_s9, 256  ;;  %p231_p3 = scmp.lt.s32.totalorder %s164_s9, %s164_s9 }
  0x2c   :  { %p227_p2 = scmp.ne.s32.totalorder %s164_s9, %s226_s10  ;;  %p232_p4 = scmp.lt.s32.totalorder %s226_s10, %s226_s10 }
  0x2d   :  { %v59_v7 = vrot.slane %v50_v6, %v58_v5  ;;  %v66_v12 = vrot.slane %v52_v9, %v58_v5 }
  0x2e   :  { %p233_p5 = por %p232_p4, %p231_p3 }
  0x2f   :  { %v75_v10 = vrot.slane %v59_v7, %v58_v5  ;;  %v67_v11 = vcombine.high %v59_v7, %v59_v7  ;;  %v82_v17 = vrot.slane %v66_v12, %v58_v5  ;;  %v68_v20 = vcombine.high %v66_v12, %v66_v12 }
  0x30   :  { %p234_p6 = pnand %p233_p5, %p227_p2 }
  0x31   :  { %v104_v14 = vrot.slane %v75_v10, %v103_v8  ;;  %v89_v15 = vrot.slane %v67_v11, %v58_v5  ;;  %v97_v16 = vcombine.high %v75_v10, %v75_v10  ;;  %v120_v27 = vrot.slane %v82_v17, %v103_v8 }
  0x32   :  { %v96_v28 = vrot.slane %v68_v20, %v58_v5  ;;  %v98_v29 = vcombine.high %v82_v17, %v82_v17 }
  0x33   :  { %v141_v21 = vadd.f32 %v104_v14, %v42_v13  ;;  %v108_v22 = vrot.slane %v89_v15, %v103_v8  ;;  %v112_v23 = vrot.slane %v97_v16, %v103_v8  ;;  %v99_v24 = vcombine.high %v89_v15, %v89_v15 }
  0x34   :  { %v145_v35 = vadd.f32 %v120_v27, %v46_v25  ;;  %v124_v36 = vrot.slane %v96_v28, %v103_v8  ;;  %v128_v37 = vrot.slane %v98_v29, %v103_v8  ;;  %v100_v38 = vcombine.high %v96_v28, %v96_v28 }
  0x35   :  { %150 = vst.msk [vmem:[#allocation8] sm:$0x3] %vm149_vm0, %v141_v21  ;;  %v142_v30 = vadd.f32 %v108_v22, %v43_v18  ;;  %v143_v31 = vadd.f32 %v112_v23, %v44_v19  ;;  %v116_v32 = vrot.slane %v99_v24, %v103_v8 }
  0x36   :  { %154 = vst.msk [vmem:[#allocation8 + $0x8] sm:$0x3] %vm149_vm0, %v145_v35  ;;  %v146_v41 = vadd.f32 %v124_v36, %v47_v33  ;;  %v147_v42 = vadd.f32 %v128_v37, %v48_v34  ;;  %v132_v43 = vrot.slane %v100_v38, %v103_v8 }
  0x37   :  { %151 = vst.msk [vmem:[#allocation8 + $0x2] sm:$0x3] %vm149_vm0, %v142_v30  ;;  %152 = vst.msk [vmem:[#allocation8 + $0x4] sm:$0x3] %vm149_vm0, %v143_v31  ;;  %v144_v39 = vadd.f32 %v116_v32, %v45_v26 }
  0x38   :  { %155 = vst.msk [vmem:[#allocation8 + $0xa] sm:$0x3] %vm149_vm0, %v146_v41  ;;  %156 = vst.msk [vmem:[#allocation8 + $0xc] sm:$0x3] %vm149_vm0, %v147_v42  ;;  %v148_v44 = vadd.f32 %v132_v43, %v49_v40 }
  0x39   :  { %153 = vst.msk [vmem:[#allocation8 + $0x6] sm:$0x3] %vm149_vm0, %v144_v39 }
  0x3a   :  { %157 = vst.msk [vmem:[#allocation8 + $0xe] sm:$0x3] %vm149_vm0, %v148_v44 }
  0x3b   :  { %237 = shalt.err (!%p234_p6)
}
  0x3c   :  { %s238_s13 = scalar_lea.hbm %s333_s3, 256 }
  0x3d   :  { %p239_p7 = scmp.ne.s32.totalorder %s333_s3, %s238_s13  ;;  %p242_p8 = scmp.lt.u32.totalorder %s238_s13, %s333_s3 }
  0x3f   :  { %p244_p9 = pnand %p242_p8, %p239_p7 }
  0x41   :  { %247 = shalt.err (!%p244_p9)
}
  0x42   :  { %169 = dma.vmem_to_hbm [thread:$0]  %s164_s9, 256, %s333_s3, [#allocation5], %s255_s21, %s255_s21, %s256_s22  }
  0x43   :  { %252 = dma.done.wait [#allocation5], 256  }
  0x44   :  { %253 = vsyncadd [#allocation5], 4294967040 }
  0x45   :  { %173 = vsyncpa [#allocation4], 1 }
  0x46   :  { %174 = vsyncpa [#allocation7], 1 }
  0x47   :  { %175 = vsyncpa [#allocation5], 1 }

</bundles_post_ra>
